<compile_context>
chip_gen: v6e
topology: v6e:2x2x1
jax: 0.10.0
libtpu: 0.0.40
codegen_flags: <defaults>
</compile_context>

<pallas_src>
import jax
import jax.numpy as jnp
from jax.experimental import pallas as pl
from jax.experimental.pallas import tpu as pltpu

N_IN = 2          # input node feature dim
C = 5             # CGConv channels
C_PAD = 8         # sublane-padded channel dim
E_DIM = 1         # edge attribute dim (module spec: dim=1)
N_OUT = 2         # output dim
Z_DIM = 2 * C + E_DIM   # 11
Z_HALF = 8        # row offset of the lin_s half in the stacked z
Z_STACK = 16      # stacked (lin_f | lin_s) output rows (tile aligned)
NUM_CONVS = 2

# ---- packed lin1/lin2 slab [32, 8], 8-aligned row starts --------------------
_R_W1, _R_B1, _R_W2, _R_B2 = 0, 8, 16, 24
_WLIN_ROWS, _WLIN_COLS = 32, 8

# ---- per-conv slab [48, 8], 16-aligned row starts ---------------------------
_CR_WI, _CR_WJ, _CR_WEB = 0, 16, 32
_CV_ROWS, _CV_COLS = 48, 8


def _net_kernel(xt_ref, tidx_ref, sidx_ref, eat_ref, wlin_ref, wcv_ref,
                out_ref, h_sc, agg_sc):
    c = pl.program_id(0)                 # which CGConv layer (sequential)
    k = pl.program_id(1)                 # edge tile (reduction axis)
    n_conv = pl.num_programs(0)
    n_etiles = pl.num_programs(1)

    # lin1 once, at the very first grid step: h = W1^T x^T + b1  -> [8, N_pad]
    @pl.when((c == 0) & (k == 0))
    def _():
        w1t = wlin_ref[_R_W1:_R_W1 + C_PAD, 0:N_IN]           # [8, 2] (rows C..7 zero)
        b1 = wlin_ref[_R_B1:_R_B1 + C_PAD, 0:1]               # [8, 1]
        h_sc[...] = jnp.dot(w1t, xt_ref[...],
                            preferred_element_type=jnp.float32) + b1

    # reset the per-conv message accumulator at the start of each edge loop
    @pl.when(k == 0)
    def _():
        agg_sc[...] = jnp.zeros_like(agg_sc)

    h = h_sc[...]                                             # [8, N_pad]
    tidx = tidx_ref[...]                                      # [1, tile_e] int32
    sidx = sidx_ref[...]                                      # [1, tile_e] int32
    eat = eat_ref[...]                                        # [1, tile_e] f32

    n_pad = h.shape[1]
    te = tidx.shape[1]

    # One-hot gather masks for this edge chunk only (VPU iota + compare).
    # Padded edges carry index n_pad -> all-zero column -> no contribution.
    iota_n = jax.lax.broadcasted_iota(jnp.int32, (n_pad, te), 0)
    gm_t = (iota_n == tidx).astype(jnp.float32)               # [N_pad, te] target one-hot
    gm_s = (iota_n == sidx).astype(jnp.float32)               # [N_pad, te] source one-hot

    xi = jnp.dot(h, gm_t, preferred_element_type=jnp.float32)  # [8, te]
    xj = jnp.dot(h, gm_s, preferred_element_type=jnp.float32)  # [8, te]

    # This conv's weights (lin_f rows 0..C-1, lin_s rows 8..8+C-1 of the stack).
    w_i = wcv_ref[_CR_WI:_CR_WI + Z_STACK, 0:C_PAD]           # [16, 8]
    w_j = wcv_ref[_CR_WJ:_CR_WJ + Z_STACK, 0:C_PAD]           # [16, 8]
    w_e = wcv_ref[_CR_WEB:_CR_WEB + Z_STACK, 0:1]             # [16, 1]
    b_fs = wcv_ref[_CR_WEB:_CR_WEB + Z_STACK, 1:2]            # [16, 1]

    z = (jnp.dot(w_i, xi, preferred_element_type=jnp.float32)
         + jnp.dot(w_j, xj, preferred_element_type=jnp.float32)
         + w_e * eat + b_fs)                                  # [16, te]
    # Tile-aligned halves; rows C..7 are dead padding (zero weights downstream).
    m = jax.nn.sigmoid(z[0:Z_HALF, :]) * jax.nn.softplus(z[Z_HALF:Z_STACK, :])  # [8, te]

    # Scatter-add over this chunk: contract both operands on the edge axis.
    agg_sc[...] += jax.lax.dot_general(
        m, gm_t, (((1,), (1,)), ((), ())),
        preferred_element_type=jnp.float32)                   # [8, N_pad]

    # End of this conv's edge loop: residual update.
    @pl.when(k == n_etiles - 1)
    def _():
        h_sc[...] = h_sc[...] + agg_sc[...]

    # After the last conv's last edge tile: lin2 into the lane-dense output.
    @pl.when((k == n_etiles - 1) & (c == n_conv - 1))
    def _():
        w2t = wlin_ref[_R_W2:_R_W2 + N_OUT, 0:C_PAD]          # [2, 8] (cols C..7 zero)
        b2 = wlin_ref[_R_B2:_R_B2 + N_OUT, 0:1]               # [2, 1]
        out_ref[...] = jnp.dot(w2t, h_sc[...],
                               preferred_element_type=jnp.float32) + b2


def pack_params(p):
    """Pack weights into (wlin [32,8], wcv [2,48,8]) f32 slabs, tile-aligned."""
    f32 = lambda v: jnp.asarray(v, jnp.float32)

    wlin = jnp.zeros((_WLIN_ROWS, _WLIN_COLS), jnp.float32)
    wlin = wlin.at[_R_W1:_R_W1 + C, 0:N_IN].set(f32(p["w1"]).T)        # [5, 2]
    wlin = wlin.at[_R_B1:_R_B1 + C, 0:1].set(f32(p["b1"]).reshape(-1, 1))
    wlin = wlin.at[_R_W2:_R_W2 + N_OUT, 0:C].set(f32(p["w2"]).T)       # [2, 5]
    wlin = wlin.at[_R_B2:_R_B2 + N_OUT, 0:1].set(f32(p["b2"]).reshape(-1, 1))

    def conv_slab(wf, bf, ws, bs):
        wf, ws = f32(wf), f32(ws)                                      # [11, 5] each
        s = jnp.zeros((_CV_ROWS, _CV_COLS), jnp.float32)
        # lin_f -> z rows 0..C-1, lin_s -> z rows 8..8+C-1
        s = s.at[_CR_WI + 0:_CR_WI + C, 0:C].set(wf[0:C, :].T)
        s = s.at[_CR_WI + Z_HALF:_CR_WI + Z_HALF + C, 0:C].set(ws[0:C, :].T)
        s = s.at[_CR_WJ + 0:_CR_WJ + C, 0:C].set(wf[C:2 * C, :].T)
        s = s.at[_CR_WJ + Z_HALF:_CR_WJ + Z_HALF + C, 0:C].set(ws[C:2 * C, :].T)
        s = s.at[_CR_WEB + 0:_CR_WEB + C, 0:1].set(wf[2 * C:, :].T)
        s = s.at[_CR_WEB + Z_HALF:_CR_WEB + Z_HALF + C, 0:1].set(ws[2 * C:, :].T)
        s = s.at[_CR_WEB + 0:_CR_WEB + C, 1:2].set(f32(bf).reshape(-1, 1))
        s = s.at[_CR_WEB + Z_HALF:_CR_WEB + Z_HALF + C, 1:2].set(f32(bs).reshape(-1, 1))
        return s

    wcv = jnp.stack([conv_slab(p["wf1"], p["bf1"], p["ws1"], p["bs1"]),
                     conv_slab(p["wf2"], p["bf2"], p["ws2"], p["bs2"])])  # [2, 48, 8]
    return wlin, wcv


def _round_up(v, m):
    return ((v + m - 1) // m) * m


def net_forward(x, edge_index, edge_attr, params, tile_e=512):
    """x: [N, 2] f32, edge_index: [2, E] int32 (row0=src j, row1=tgt i),
    edge_attr: [E, 1] f32.  Returns [N, 2] f32."""
    assert tile_e % 128 == 0
    n = x.shape[0]
    e = edge_index.shape[1]
    assert edge_attr.shape == (e, E_DIM) and E_DIM == 1

    n_pad = _round_up(max(n, 1), 128)
    e_pad = _round_up(max(e, 1), tile_e)

    # Lane-padded, transposed (lane-dense) operands.
    xt = jnp.zeros((N_IN, n_pad), jnp.float32).at[:, :n].set(
        jnp.asarray(x, jnp.float32).T)
    src = edge_index[0].astype(jnp.int32)
    tgt = edge_index[1].astype(jnp.int32)
    # Padded edges point at node index n_pad (out of range) -> all-zero one-hot.
    tidx = jnp.full((1, e_pad), n_pad, jnp.int32).at[0, :e].set(tgt)
    sidx = jnp.full((1, e_pad), n_pad, jnp.int32).at[0, :e].set(src)
    eat = jnp.zeros((1, e_pad), jnp.float32).at[0, :e].set(
        jnp.asarray(edge_attr, jnp.float32)[:, 0])

    wlin, wcv = pack_params(params)

    grid = (NUM_CONVS, e_pad // tile_e)   # (conv layer, edge tile) — both sequential
    out_t = pl.pallas_call(
        _net_kernel,
        out_shape=jax.ShapeDtypeStruct((N_OUT, n_pad), jnp.float32),
        grid=grid,
        in_specs=[
            pl.BlockSpec((N_IN, n_pad), lambda c, k: (0, 0)),            # xt (resident)
            pl.BlockSpec((1, tile_e), lambda c, k: (0, k)),              # tidx chunk
            pl.BlockSpec((1, tile_e), lambda c, k: (0, k)),              # sidx chunk
            pl.BlockSpec((1, tile_e), lambda c, k: (0, k)),              # eat chunk
            pl.BlockSpec((_WLIN_ROWS, _WLIN_COLS), lambda c, k: (0, 0)),  # lin weights
            pl.BlockSpec((None, _CV_ROWS, _CV_COLS), lambda c, k: (c, 0, 0)),  # conv c
        ],
        out_specs=pl.BlockSpec((N_OUT, n_pad), lambda c, k: (0, 0)),
        scratch_shapes=[pltpu.VMEM((C_PAD, n_pad), jnp.float32),   # h (persists)
                        pltpu.VMEM((C_PAD, n_pad), jnp.float32)],  # agg accumulator
        compiler_params=pltpu.CompilerParams(
            dimension_semantics=("arbitrary", "arbitrary"),
            vmem_limit_bytes=48 * 1024 * 1024),
    )(xt, tidx, sidx, eat, wlin, wcv)
    return out_t[:, :n].T                                        # [N, N_OUT]


def net_forward_ref(x, edge_index, edge_attr, p):
    """Pure-JAX reference mirroring the PyTorch module."""
    h = x @ p["w1"] + p["b1"]
    src, tgt = edge_index[0], edge_index[1]

    def cgconv(h, wf, bf, ws, bs):
        xi = h[tgt]
        xj = h[src]
        z = jnp.concatenate([xi, xj, edge_attr], axis=-1)
        m = jax.nn.sigmoid(z @ wf + bf) * jax.nn.softplus(z @ ws + bs)
        agg = jnp.zeros_like(h).at[tgt].add(m)
        return h + agg

    h = cgconv(h, p["wf1"], p["bf1"][0], p["ws1"], p["bs1"][0])
    h = cgconv(h, p["wf2"], p["bf2"][0], p["ws2"], p["bs2"][0])
    return h @ p["w2"] + p["b2"]


def init_params(key):
    ks = jax.random.split(key, 10)
    s = 0.1
    return {
        "w1": s * jax.random.normal(ks[0], (N_IN, C), jnp.float32),
        "b1": s * jax.random.normal(ks[1], (1, C), jnp.float32),
        "wf1": s * jax.random.normal(ks[2], (Z_DIM, C), jnp.float32),
        "bf1": s * jax.random.normal(ks[3], (1, C), jnp.float32),
        "ws1": s * jax.random.normal(ks[4], (Z_DIM, C), jnp.float32),
        "bs1": s * jax.random.normal(ks[5], (1, C), jnp.float32),
        "wf2": s * jax.random.normal(ks[6], (Z_DIM, C), jnp.float32),
        "bf2": s * jax.random.normal(ks[7], (1, C), jnp.float32),
        "ws2": s * jax.random.normal(ks[8], (Z_DIM, C), jnp.float32),
        "bs2": s * jax.random.normal(ks[9], (1, C), jnp.float32),
        "w2": s * jax.random.normal(jax.random.fold_in(key, 100), (C, N_OUT), jnp.float32),
        "b2": s * jax.random.normal(jax.random.fold_in(key, 101), (1, N_OUT), jnp.float32),
    }


if __name__ == "__main__":
    key = jax.random.PRNGKey(0)
    k_x, k_e, k_src, k_tgt, k_p = jax.random.split(key, 5)

    # small graph: 64 nodes, bidirectional ring (128 edges) + 72 random edges
    n_nodes = 64
    ring = jnp.arange(n_nodes)
    src = jnp.concatenate([ring, (ring + 1) % n_nodes,
                           jax.random.randint(k_src, (72,), 0, n_nodes)])
    tgt = jnp.concatenate([(ring + 1) % n_nodes, ring,
                           jax.random.randint(k_tgt, (72,), 0, n_nodes)])
    edge_index = jnp.stack([src, tgt]).astype(jnp.int32)          # [2, 200]
    edge_attr = jax.random.normal(k_e, (edge_index.shape[1], E_DIM), jnp.float32)
    x = jax.random.normal(k_x, (n_nodes, N_IN), jnp.float32)      # data.x: [N, 2]

    params = init_params(k_p)

    # tile_e=128 at demo scale so the edge-tile grid/accumulator path is exercised
    # (grid = (2 convs, 2 edge tiles)); default 512 for real graphs.
    out = net_forward(x, edge_index, edge_attr, params, tile_e=128)
    out = jax.block_until_ready(out)

    ref = net_forward_ref(x, edge_index, edge_attr, params)
    assert out.shape == (n_nodes, N_OUT)
    assert jnp.allclose(out, ref, atol=1e-5, rtol=1e-5), (out, ref)

    print("KERNEL_OK")
</pallas_src>

<mosaic_0001>
module attributes {stable_mosaic.version = 11 : i64} {
  func.func @_net_kernel(%arg0: i32, %arg1: i32, %arg2: memref<2x128xf32, #tpu.memory_space<vmem>>, %arg3: memref<1x128xi32, #tpu.memory_space<vmem>>, %arg4: memref<1x128xi32, #tpu.memory_space<vmem>>, %arg5: memref<1x128xf32, #tpu.memory_space<vmem>>, %arg6: memref<32x8xf32, #tpu.memory_space<vmem>>, %arg7: memref<1x48x8xf32, #tpu.memory_space<vmem>>, %arg8: memref<2x128xf32, #tpu.memory_space<vmem>>, %arg9: memref<8x128xf32, #tpu.memory_space<vmem>>, %arg10: memref<8x128xf32, #tpu.memory_space<vmem>>) attributes {dimension_semantics = [#tpu.dimension_semantics<arbitrary>, #tpu.dimension_semantics<arbitrary>], iteration_bounds = array<i64: 2, 2>, scalar_prefetch = 0 : i64, scratch_operands = 2 : i64, tpu.core_type = #tpu.core_type<tc>, window_params = [{pipeline_mode = #tpu.pipeline_mode<synchronous>, transform_indices = @transform_0, window_bounds = array<i64: 2, 128>}, {transform_indices = @transform_1, window_bounds = array<i64: 1, 128>}, {transform_indices = @transform_2, window_bounds = array<i64: 1, 128>}, {transform_indices = @transform_3, window_bounds = array<i64: 1, 128>}, {pipeline_mode = #tpu.pipeline_mode<synchronous>, transform_indices = @transform_4, window_bounds = array<i64: 32, 8>}, {transform_indices = @transform_5, window_bounds = array<i64: 1, 48, 8>}, {pipeline_mode = #tpu.pipeline_mode<synchronous>, transform_indices = @transform_6, window_bounds = array<i64: 2, 128>}]} {
    %c0_i32 = arith.constant 0 : i32
    %0 = arith.cmpi eq, %arg0, %c0_i32 : i32
    %c0_i32_0 = arith.constant 0 : i32
    %1 = arith.cmpi eq, %arg1, %c0_i32_0 : i32
    %2 = arith.andi %0, %1 : i1
    %3 = arith.extui %2 : i1 to i32
    %c0_i32_1 = arith.constant 0 : i32
    %4 = arith.cmpi ne, %3, %c0_i32_1 : i32
    scf.if %4 {
      %c0_35 = arith.constant 0 : index
      %c0_36 = arith.constant 0 : index
      %74 = vector.load %arg6[%c0_35, %c0_36] : memref<32x8xf32, #tpu.memory_space<vmem>>, vector<8x2xf32>
      %c8 = arith.constant 8 : index
      %c0_37 = arith.constant 0 : index
      %75 = vector.load %arg6[%c8, %c0_37] : memref<32x8xf32, #tpu.memory_space<vmem>>, vector<8x1xf32>
      %c0_38 = arith.constant 0 : index
      %c0_39 = arith.constant 0 : index
      %76 = vector.load %arg2[%c0_38, %c0_39] : memref<2x128xf32, #tpu.memory_space<vmem>>, vector<2x128xf32>
      %cst_40 = arith.constant dense<0.000000e+00> : vector<8x128xf32>
      %77 = tpu.matmul %74, %76, %cst_40 {dimension_numbers = #tpu.dot_dimension_numbers<[1], [0], [0], [1], [0, 0, 1, 1], [], []>} : vector<8x2xf32>, vector<2x128xf32>, vector<8x128xf32> -> vector<8x128xf32>
      %78 = vector.broadcast %75 : vector<8x1xf32> to vector<8x128xf32>
      %79 = arith.addf %77, %78 : vector<8x128xf32>
      %c0_41 = arith.constant 0 : index
      %c0_42 = arith.constant 0 : index
      %80 = vector.load %arg9[%c0_41, %c0_42] : memref<8x128xf32, #tpu.memory_space<vmem>>, vector<8x128xf32>
      tpu.vector_store %arg9[%c0_41, %c0_42], %79 {strides = array<i32>} : memref<8x128xf32, #tpu.memory_space<vmem>>, vector<8x128xf32>,
    } else {
    }
    %c0_i32_2 = arith.constant 0 : i32
    %5 = arith.cmpi eq, %arg1, %c0_i32_2 : i32
    %6 = arith.extui %5 : i1 to i32
    %c0_i32_3 = arith.constant 0 : i32
    %7 = arith.cmpi ne, %6, %c0_i32_3 : i32
    scf.if %7 {
      %cst_35 = arith.constant 0.000000e+00 : f32
      %74 = vector.broadcast %cst_35 : f32 to vector<8x128xf32>
      %c0_36 = arith.constant 0 : index
      %c0_37 = arith.constant 0 : index
      %75 = vector.load %arg10[%c0_36, %c0_37] : memref<8x128xf32, #tpu.memory_space<vmem>>, vector<8x128xf32>
      tpu.vector_store %arg10[%c0_36, %c0_37], %74 {strides = array<i32>} : memref<8x128xf32, #tpu.memory_space<vmem>>, vector<8x128xf32>,
    } else {
    }
    %c0 = arith.constant 0 : index
    %c0_4 = arith.constant 0 : index
    %8 = vector.load %arg9[%c0, %c0_4] : memref<8x128xf32, #tpu.memory_space<vmem>>, vector<8x128xf32>
    %c0_5 = arith.constant 0 : index
    %c0_6 = arith.constant 0 : index
    %9 = vector.load %arg3[%c0_5, %c0_6] : memref<1x128xi32, #tpu.memory_space<vmem>>, vector<1x128xi32>
    %c0_7 = arith.constant 0 : index
    %c0_8 = arith.constant 0 : index
    %10 = vector.load %arg4[%c0_7, %c0_8] : memref<1x128xi32, #tpu.memory_space<vmem>>, vector<1x128xi32>
    %c0_9 = arith.constant 0 : index
    %c0_10 = arith.constant 0 : index
    %11 = vector.load %arg5[%c0_9, %c0_10] : memref<1x128xf32, #tpu.memory_space<vmem>>, vector<1x128xf32>
    %12 = tpu.iota {dimensions = array<i32: 0>} : vector<128x128xi32>
    %13 = vector.broadcast %9 : vector<1x128xi32> to vector<128x128xi32>
    %14 = arith.cmpi eq, %12, %13 : vector<128x128xi32>
    %15 = arith.extui %14 : vector<128x128xi1> to vector<128x128xi32>
    %16 = arith.sitofp %15 : vector<128x128xi32> to vector<128x128xf32>
    %17 = vector.broadcast %10 : vector<1x128xi32> to vector<128x128xi32>
    %18 = arith.cmpi eq, %12, %17 : vector<128x128xi32>
    %19 = arith.extui %18 : vector<128x128xi1> to vector<128x128xi32>
    %20 = arith.sitofp %19 : vector<128x128xi32> to vector<128x128xf32>
    %cst = arith.constant dense<0.000000e+00> : vector<8x128xf32>
    %21 = tpu.matmul %8, %16, %cst {dimension_numbers = #tpu.dot_dimension_numbers<[1], [0], [0], [1], [0, 0, 1, 1], [], []>} : vector<8x128xf32>, vector<128x128xf32>, vector<8x128xf32> -> vector<8x128xf32>
    %cst_11 = arith.constant dense<0.000000e+00> : vector<8x128xf32>
    %22 = tpu.matmul %8, %20, %cst_11 {dimension_numbers = #tpu.dot_dimension_numbers<[1], [0], [0], [1], [0, 0, 1, 1], [], []>} : vector<8x128xf32>, vector<128x128xf32>, vector<8x128xf32> -> vector<8x128xf32>
    %c0_12 = arith.constant 0 : index
    %c0_13 = arith.constant 0 : index
    %c0_14 = arith.constant 0 : index
    %23 = vector.load %arg7[%c0_12, %c0_13, %c0_14] : memref<1x48x8xf32, #tpu.memory_space<vmem>>, vector<1x16x8xf32>
    %24 = vector.shape_cast %23 : vector<1x16x8xf32> to vector<16x8xf32>
    %c0_15 = arith.constant 0 : index
    %c16 = arith.constant 16 : index
    %c0_16 = arith.constant 0 : index
    %25 = vector.load %arg7[%c0_15, %c16, %c0_16] : memref<1x48x8xf32, #tpu.memory_space<vmem>>, vector<1x16x8xf32>
    %26 = vector.shape_cast %25 : vector<1x16x8xf32> to vector<16x8xf32>
    %c0_17 = arith.constant 0 : index
    %c32 = arith.constant 32 : index
    %c0_18 = arith.constant 0 : index
    %27 = vector.load %arg7[%c0_17, %c32, %c0_18] : memref<1x48x8xf32, #tpu.memory_space<vmem>>, vector<1x16x1xf32>
    %28 = vector.shape_cast %27 : vector<1x16x1xf32> to vector<16x1xf32>
    %c0_19 = arith.constant 0 : index
    %c32_20 = arith.constant 32 : index
    %c1 = arith.constant 1 : index
    %29 = vector.load %arg7[%c0_19, %c32_20, %c1] : memref<1x48x8xf32, #tpu.memory_space<vmem>>, vector<1x16x1xf32>
    %30 = vector.shape_cast %29 : vector<1x16x1xf32> to vector<16x1xf32>
    %cst_21 = arith.constant dense<0.000000e+00> : vector<16x128xf32>
    %31 = tpu.matmul %24, %21, %cst_21 {dimension_numbers = #tpu.dot_dimension_numbers<[1], [0], [0], [1], [0, 0, 1, 1], [], []>} : vector<16x8xf32>, vector<8x128xf32>, vector<16x128xf32> -> vector<16x128xf32>
    %cst_22 = arith.constant dense<0.000000e+00> : vector<16x128xf32>
    %32 = tpu.matmul %26, %22, %cst_22 {dimension_numbers = #tpu.dot_dimension_numbers<[1], [0], [0], [1], [0, 0, 1, 1], [], []>} : vector<16x8xf32>, vector<8x128xf32>, vector<16x128xf32> -> vector<16x128xf32>
    %33 = arith.addf %31, %32 : vector<16x128xf32>
    %34 = vector.broadcast %28 : vector<16x1xf32> to vector<16x128xf32>
    %35 = vector.broadcast %11 : vector<1x128xf32> to vector<16x128xf32>
    %36 = arith.mulf %34, %35 : vector<16x128xf32>
    %37 = arith.addf %33, %36 : vector<16x128xf32>
    %38 = vector.broadcast %30 : vector<16x1xf32> to vector<16x128xf32>
    %39 = arith.addf %37, %38 : vector<16x128xf32>
    %40 = vector.extract_strided_slice %39 {offsets = [0, 0], sizes = [8, 128], strides = [1, 1]} : vector<16x128xf32> to vector<8x128xf32>
    %41 = arith.negf %40 : vector<8x128xf32>
    %42 = math.exp %41 : vector<8x128xf32>
    %cst_23 = arith.constant 1.000000e+00 : f32
    %43 = vector.broadcast %cst_23 : f32 to vector<8x128xf32>
    %44 = arith.addf %43, %42 : vector<8x128xf32>
    %45 = arith.divf %43, %44 : vector<8x128xf32>
    %46 = vector.extract_strided_slice %39 {offsets = [8, 0], sizes = [8, 128], strides = [1, 1]} : vector<16x128xf32> to vector<8x128xf32>
    %cst_24 = arith.constant 0.000000e+00 : f32
    %47 = vector.broadcast %cst_24 : f32 to vector<8x128xf32>
    %48 = arith.maximumf %46, %47 : vector<8x128xf32>
    %49 = vector.broadcast %cst_24 : f32 to vector<8x128xf32>
    %50 = arith.subf %46, %49 : vector<8x128xf32>
    %51 = arith.cmpf one, %50, %50 : vector<8x128xf32>
    %52 = vector.broadcast %cst_24 : f32 to vector<8x128xf32>
    %53 = arith.addf %46, %52 : vector<8x128xf32>
    %54 = math.absf %50 : vector<8x128xf32>
    %cst_25 = arith.constant 0.000000e+00 : f32
    %55 = vector.broadcast %cst_25 : f32 to vector<8x128xf32>
    %56 = arith.subf %55, %54 : vector<8x128xf32>
    %57 = math.exp %56 : vector<8x128xf32>
    %58 = math.log1p %57 : vector<8x128xf32>
    %59 = arith.addf %48, %58 : vector<8x128xf32>
    %60 = arith.select %51, %53, %59 : vector<8x128xi1>, vector<8x128xf32>
    %61 = arith.mulf %45, %60 : vector<8x128xf32>
    %c0_26 = arith.constant 0 : index
    %c0_27 = arith.constant 0 : index
    %62 = vector.load %arg10[%c0_26, %c0_27] : memref<8x128xf32, #tpu.memory_space<vmem>>, vector<8x128xf32>
    %cst_28 = arith.constant dense<0.000000e+00> : vector<8x128xf32>
    %63 = tpu.matmul %61, %16, %cst_28 {dimension_numbers = #tpu.dot_dimension_numbers<[1], [1], [0], [0], [0, 0, 1, 0], [], []>} : vector<8x128xf32>, vector<128x128xf32>, vector<8x128xf32> -> vector<8x128xf32>
    %64 = arith.addf %62, %63 : vector<8x128xf32>
    %c0_29 = arith.constant 0 : index
    %c0_30 = arith.constant 0 : index
    %65 = vector.load %arg10[%c0_29, %c0_30] : memref<8x128xf32, #tpu.memory_space<vmem>>, vector<8x128xf32>
    tpu.vector_store %arg10[%c0_29, %c0_30], %64 {strides = array<i32>} : memref<8x128xf32, #tpu.memory_space<vmem>>, vector<8x128xf32>,
    %c1_i32 = arith.constant 1 : i32
    %66 = arith.cmpi eq, %arg1, %c1_i32 : i32
    %67 = arith.extui %66 : i1 to i32
    %c0_i32_31 = arith.constant 0 : i32
    %68 = arith.cmpi ne, %67, %c0_i32_31 : i32
    scf.if %68 {
      %c0_35 = arith.constant 0 : index
      %c0_36 = arith.constant 0 : index
      %74 = vector.load %arg9[%c0_35, %c0_36] : memref<8x128xf32, #tpu.memory_space<vmem>>, vector<8x128xf32>
      %c0_37 = arith.constant 0 : index
      %c0_38 = arith.constant 0 : index
      %75 = vector.load %arg10[%c0_37, %c0_38] : memref<8x128xf32, #tpu.memory_space<vmem>>, vector<8x128xf32>
      %76 = arith.addf %74, %75 : vector<8x128xf32>
      %c0_39 = arith.constant 0 : index
      %c0_40 = arith.constant 0 : index
      %77 = vector.load %arg9[%c0_39, %c0_40] : memref<8x128xf32, #tpu.memory_space<vmem>>, vector<8x128xf32>
      tpu.vector_store %arg9[%c0_39, %c0_40], %76 {strides = array<i32>} : memref<8x128xf32, #tpu.memory_space<vmem>>, vector<8x128xf32>,
    } else {
    }
    %c1_i32_32 = arith.constant 1 : i32
    %69 = arith.cmpi eq, %arg1, %c1_i32_32 : i32
    %c1_i32_33 = arith.constant 1 : i32
    %70 = arith.cmpi eq, %arg0, %c1_i32_33 : i32
    %71 = arith.andi %69, %70 : i1
    %72 = arith.extui %71 : i1 to i32
    %c0_i32_34 = arith.constant 0 : i32
    %73 = arith.cmpi ne, %72, %c0_i32_34 : i32
    scf.if %73 {
      %c16_35 = arith.constant 16 : index
      %c0_36 = arith.constant 0 : index
      %74 = vector.load %arg6[%c16_35, %c0_36] : memref<32x8xf32, #tpu.memory_space<vmem>>, vector<2x8xf32>
      %c24 = arith.constant 24 : index
      %c0_37 = arith.constant 0 : index
      %75 = vector.load %arg6[%c24, %c0_37] : memref<32x8xf32, #tpu.memory_space<vmem>>, vector<2x1xf32>
      %c0_38 = arith.constant 0 : index
      %c0_39 = arith.constant 0 : index
      %76 = vector.load %arg9[%c0_38, %c0_39] : memref<8x128xf32, #tpu.memory_space<vmem>>, vector<8x128xf32>
      %cst_40 = arith.constant dense<0.000000e+00> : vector<2x128xf32>
      %77 = tpu.matmul %74, %76, %cst_40 {dimension_numbers = #tpu.dot_dimension_numbers<[1], [0], [0], [1], [0, 0, 1, 1], [], []>} : vector<2x8xf32>, vector<8x128xf32>, vector<2x128xf32> -> vector<2x128xf32>
      %78 = vector.broadcast %75 : vector<2x1xf32> to vector<2x128xf32>
      %79 = arith.addf %77, %78 : vector<2x128xf32>
      %c0_41 = arith.constant 0 : index
      %c0_42 = arith.constant 0 : index
      %80 = vector.load %arg8[%c0_41, %c0_42] : memref<2x128xf32, #tpu.memory_space<vmem>>, vector<2x128xf32>
      tpu.vector_store %arg8[%c0_41, %c0_42], %79 {strides = array<i32>} : memref<2x128xf32, #tpu.memory_space<vmem>>, vector<2x128xf32>,
    } else {
    }
    return
  }
  func.func @transform_0(%arg0: i32, %arg1: i32) -> (i32, i32) {
    %c0_i32 = arith.constant 0 : i32
    %c0_i32_0 = arith.constant 0 : i32
    %c0_i32_1 = arith.constant 0 : i32
    return %c0_i32, %c0_i32_0 : i32, i32
  }
  func.func @transform_1(%arg0: i32, %arg1: i32) -> (i32, i32) {
    %c0_i32 = arith.constant 0 : i32
    %c0_i32_0 = arith.constant 0 : i32
    return %c0_i32, %arg1 : i32, i32
  }
  func.func @transform_2(%arg0: i32, %arg1: i32) -> (i32, i32) {
    %c0_i32 = arith.constant 0 : i32
    %c0_i32_0 = arith.constant 0 : i32
    return %c0_i32, %arg1 : i32, i32
  }
  func.func @transform_3(%arg0: i32, %arg1: i32) -> (i32, i32) {
    %c0_i32 = arith.constant 0 : i32
    %c0_i32_0 = arith.constant 0 : i32
    return %c0_i32, %arg1 : i32, i32
  }
  func.func @transform_4(%arg0: i32, %arg1: i32) -> (i32, i32) {
    %c0_i32 = arith.constant 0 : i32
    %c0_i32_0 = arith.constant 0 : i32
    %c0_i32_1 = arith.constant 0 : i32
    return %c0_i32, %c0_i32_0 : i32, i32
  }
  func.func @transform_5(%arg0: i32, %arg1: i32) -> (i32, i32, i32) {
    %c0_i32 = arith.constant 0 : i32
    %c0_i32_0 = arith.constant 0 : i32
    %c0_i32_1 = arith.constant 0 : i32
    return %arg0, %c0_i32, %c0_i32_0 : i32, i32, i32
  }
  func.func @transform_6(%arg0: i32, %arg1: i32) -> (i32, i32) {
    %c0_i32 = arith.constant 0 : i32
    %c0_i32_0 = arith.constant 0 : i32
    %c0_i32_1 = arith.constant 0 : i32
    return %c0_i32, %c0_i32_0 : i32, i32
  }
}

</mosaic_0001>

<bundles_post_ra>
// kernel: tpu_custom_call.1
= control target key start
LH: loop header
LB: loop body
LE: loop exit
PB: predicated region body
PF: predicated region fallthrough
CT: control target
= control target key end

     0   :  { %11 = vsyncpa [#allocation5], 0  ;;  %s1609_s21 = smov 0   ;;  %s1611_s22 = smov 0   ;;  %s2043_s0 = inlined_call_operand.vmem [shape: f32[2,128], index: 0, kind: input, shape index: {}]   ;;  %s2044_s1 = inlined_call_operand.vmem [shape: s32[1,256], index: 1, kind: input, shape index: {}]   ;;  %s2045_s2 = inlined_call_operand.vmem [shape: s32[1,256], index: 2, kind: input, shape index: {}]   ;;  %s2046_s3 = inlined_call_operand.vmem [shape: f32[1,256], index: 3, kind: input, shape index: {}]   ;;  %s2047_s4 = inlined_call_operand.vmem [shape: f32[32,8], index: 4, kind: input, shape index: {}]   ;;  %s2048_s5 = inlined_call_operand.vmem [shape: f32[2,48,8], index: 5, kind: input, shape index: {}]   ;;  %s2049_s6 = inlined_call_operand.hbm [shape: f32[2,128], index: 6, kind: output, shape index: {}]  }
   0x1   :  { %s1613_s23 = smov 0   ;;  %s1615_s24 = smov 0  }
   0x2   :  { %s1617_s25 = smov 0  }
   0x3 LB: > { %s26_s27 = sadd.s32 1, %s1551_s23  ;;  %s29_s28 = sadd.s32 1, %s1555_s24  ;;  %s1559_s25 = sphi %s1617_s25, %s17_s25   ;;  %s1555_s24 = sphi %s1615_s24, %s2067_s24   ;;  %s1551_s23 = sphi %s1613_s23, %s2066_s23   ;;  %s1547_s22 = sphi %s1611_s22, %s2065_s22   ;;  %s1543_s21 = sphi %s1609_s21, %s2064_s21  }
   0x4   : > { %p27_p0 = scmp.ge.s32.totalorder %s26_s27, 2  ;;  %p1134_p1 = scmp.ge.s32.totalorder %s1559_s25, 1 }
   0x5   : > { %p244_p2 = scmp.lt.s32.totalorder %s1559_s25, 5 }
   0x6   : > { %s2069_s27 = smov (%p27_p0, %s26_s27), 0  ;;  %s2071_s28 = smov (!%p27_p0, %s29_s28), %s1555_s24 }
   0x7   : > { %p245_p3 = pnand %p1134_p1, %p244_p2  ;;  %p31_p4 = scmp.ge.s32.totalorder %s2071_s28, 2 }
   0x8   : > { %p278_p5 = scmp.lt.s32.totalorder (!%p245_p3), %s1543_s21, 1  ;;  %p287_p6 = scmp.lt.s32.totalorder (!%p245_p3), %s1547_s22, 1 }
   0x9   : > { %s2073_s28 = smov (%p31_p4, %s2071_s28), 0  ;;  %248 = sbr.rel (%p245_p3) target bundleno = 1168 (0x490), region = 44 }
   0xa   : > { %p292_p7 = scmp.eq.s32.totalorder (!%p245_p3), %s1547_s22, 0  ;;  %p293_p8 = scmp.eq.s32.totalorder (!%p245_p3), %s1543_s21, 0 }
   0xc   : > { %p294_p9 = pnand (!%p245_p3), %p293_p8, %p292_p7 }
   0xe   : > { %s1649_s29 = scalar_select %p278_p5, %s1543_s21, 1 }
   0xf   : > { %s288_s30 = scalar_select %p287_p6, %s1547_s22, 1 }
  0x10   : > { %s280_s9 = scalar_lea.vmem %s2044_s1, %s1649_s29  ;;  %s283_s12 = scalar_lea.vmem %s2045_s2, %s1649_s29 }
  0x11   : > { %s286_s15 = scalar_lea.vmem %s2046_s3, %s1649_s29  ;;  %s1419_s16 = smul.u32 48, %s288_s30 }
  0x12   : > { %297 = sbr.rel (%p294_p9) target bundleno = 222 (0xde), region = 48 }
  0x13   : > { %s1667_s19 = scalar_lea.vmem %s2048_s5, %s1419_s16 }
  0x17   : > { %v300_v0 = vld [vmem:[%s2043_s0] sm:$0x3]  ;;  %vm310_vm0 = vcmask 1041408   ;;  %v1561_v2 = vmov 0.0   ;;  %vm1562_vm1 = vmmov 0   ;;  %vm306_vm2 = vcmask 15360  }
  0x18   : > { %v298_v1 = vld [vmem:[%s2047_s4] sm:$0xff]  ;;  %1294 = vmatprep.subr.mxu0 %v1561_v2  ;;  %1296 = vmatprep.mubr.msk.f32.mxu0 %vm1562_vm1, %v1561_v2  ;;  %v299_v3 = vld [vmem:[%s2047_s4 + $0x8] sm:$0xff]  ;;  %v1563_v4 = vmov 0  }
  0x19   : > { %1295 = vmatpush3.msk.msra.mxu0 %vm310_vm0, %v300_v0  ;;  %1479 = vset.pattern.permute.xlu0 %v1563_v4 }
  0x1a   : > { %1297 = vmatmul.mubr.msk.f32.vlgmr.msra.gmra.mxu0 %vm306_vm2, %v298_v1  ;;  %303 = vperm.xlu0 %1479, %v299_v3  }
  0x95   : > { %v304_v5 = vpop.permute.xlu0 %303 }
  0xda   : > { %v380_v6 = vpop.f32.mrf.mxu0 }
  0xdb   : > { %v381_v7 = vadd.f32 %v380_v6, %v304_v5 }
  0xdc   : > { %v1298_v8 = vpop.f32.mrf.mxu0 }
  0xdd   : > { %384 = vst [vmem:[#allocation2] sm:$0xff] %v381_v7 }
  0xde PF: > { %p1138_p10 = scmp.ne.s32.totalorder %s1543_s21, 0 }
  0xe0   : > { %387 = sbr.rel (%p1138_p10) target bundleno = 231 (0xe7), region = 52 }
  0xe5   : > { %v1564_v9 = vmov 0.0  }
  0xe6   : > { %388 = vst [vmem:[#allocation3] sm:$0xff] %v1564_v9 }
  0xe7 PF: > { %v393_v10 = vlaneseq  ;;  %v1565_v11 = vmov 0.0   ;;  %vm1566_vm3 = vmmov 0   ;;  %v1689_v13 = vld [vmem:[%s280_s9] ss:$0 sm:$0xff]  ;;  %v1567_v18 = vmov 1.0   ;;  %v656_v33 = vld [vmem:[%s1667_s19 + $0x10] sm:$0xff] }
  0xe8   : > { %1299 = vmatprep.subr.mxu1 %v1565_v11  ;;  %1331 = vmatprep.mubr.msk.f32.mxu1 %vm1566_vm3, %v1565_v11  ;;  %v1156_v30 = vld [vmem:[%s283_s12] ss:$0 sm:$0xff]  ;;  %v659_v34 = vld [vmem:[%s1667_s19 + $0x28] sm:$0xff]  ;;  %v1568_v36 = vmov 0   ;;  %v1569_v37 = vmov 1   ;;  %v657_v42 = vld [vmem:[%s1667_s19 + $0x18] sm:$0xff] }
  0xe9   : > { %v1682_v12 = vshrl.u32 %v393_v10, 7  ;;  %v389_v31 = vld [vmem:[#allocation2] sm:$0xff]  ;;  %1480 = vset.pattern.permute.xlu0 %v1568_v36  ;;  %1482 = vset.pattern.permute.xlu1 %v1568_v36  ;;  %v655_v39 = vld [vmem:[%s1667_s19 + $0x8] sm:$0xff]  ;;  %p951_p11 = scmp.eq.s32.totalorder %s1543_s21, 1  ;;  %p1227_p12 = scmp.ne.s32.totalorder %s1543_s21, 1 }
  0xea   : > { %v654_v32 = vld [vmem:[%s1667_s19] sm:$0xff]  ;;  %830 = vperm.xlu0 %1480, %v659_v34  }
  0xeb   : > { %v1692_v14 = vadd.s32 120, %v1682_v12  ;;  %v1695_v15 = vadd.s32 112, %v1682_v12  ;;  %v1698_v16 = vadd.s32 104, %v1682_v12  ;;  %v1705_v17 = vadd.s32 96, %v1682_v12  ;;  %v658_v35 = vld [vmem:[%s1667_s19 + $0x20] sm:$0xff] }
  0xec   : > { %v1715_v19 = vadd.s32 88, %v1682_v12  ;;  %v1725_v20 = vadd.s32 80, %v1682_v12  ;;  %v1735_v21 = vadd.s32 72, %v1682_v12  ;;  %v1745_v22 = vadd.s32 64, %v1682_v12  ;;  %825 = vperm.xlu1 %1482, %v658_v35   ;;  %v1209_v45 = vld [vmem:[%s286_s15] ss:$0 sm:$0xff] }
  0xed   : > { %vm429_vm4 = vcmp.eq.s32.totalorder %v1692_v14, %v1689_v13  ;;  %vm428_vm5 = vcmp.eq.s32.totalorder %v1695_v15, %v1689_v13  ;;  %vm427_vm6 = vcmp.eq.s32.totalorder %v1698_v16, %v1689_v13  ;;  %vm426_vm7 = vcmp.eq.s32.totalorder %v1705_v17, %v1689_v13 }
  0xee   : > { %1300 = vmatpush3.msk.msra.mxu1 %vm429_vm4, %v1567_v18  ;;  %vm425_vm8 = vcmp.eq.s32.totalorder %v1715_v19, %v1689_v13  ;;  %vm424_vm9 = vcmp.eq.s32.totalorder %v1725_v20, %v1689_v13  ;;  %vm423_vm10 = vcmp.eq.s32.totalorder %v1735_v21, %v1689_v13  ;;  %v1755_v23 = vadd.s32 56, %v1682_v12  ;;  %1481 = vset.pattern.permute.xlu0 %v1569_v37 }
  0xef   : > { %1301 = vmatprep.subr.mxu1 %v1565_v11  ;;  %vm422_vm11 = vcmp.eq.s32.totalorder %v1745_v22, %v1689_v13  ;;  %v1765_v24 = vadd.s32 48, %v1682_v12  ;;  %v1775_v25 = vadd.s32 40, %v1682_v12  ;;  %v1785_v26 = vadd.s32 32, %v1682_v12  ;;  %848 = vperm.xlu0 %1481, %v659_v34  }
  0xf0   : > { %1302 = vmatpush3.msk.msra.mxu1 %vm428_vm5, %v1567_v18  ;;  %vm421_vm12 = vcmp.eq.s32.totalorder %v1755_v23, %v1689_v13  ;;  %v1795_v27 = vadd.s32 24, %v1682_v12  ;;  %v1805_v28 = vadd.s32 16, %v1682_v12  ;;  %v1815_v29 = vadd.s32 8, %v1682_v12  ;;  %1483 = vset.pattern.permute.xlu1 %v1569_v37 }
  0xf1   : > { %1303 = vmatprep.subr.mxu1 %v1565_v11  ;;  %vm420_vm13 = vcmp.eq.s32.totalorder %v1765_v24, %v1689_v13  ;;  %vm2055_vm14 = vcmp.eq.s32.totalorder %v1775_v25, %v1689_v13  ;;  %vm2052_vm15 = vcmp.eq.s32.totalorder %v1785_v26, %v1689_v13  ;;  %844 = vperm.xlu1 %1483, %v658_v35  }
  0xf2   : > { %1304 = vmatpush3.msk.msra.mxu1 %vm427_vm6, %v1567_v18  ;;  %vm2050_vm0 = vcmp.eq.s32.totalorder %v1795_v27, %v1689_v13  ;;  %vm2051_vm1 = vcmp.eq.s32.totalorder %v1805_v28, %v1689_v13  ;;  %vm2053_vm2 = vcmp.eq.s32.totalorder %v1815_v29, %v1689_v13 }
  0xf3   : > { %1305 = vmatprep.subr.mxu1 %v1565_v11 }
  0xf4   : > { %1306 = vmatpush3.msk.msra.mxu1 %vm426_vm7, %v1567_v18 }
  0xf5   : > { %1307 = vmatprep.subr.mxu1 %v1565_v11 }
  0xf6   : > { %1308 = vmatpush3.msk.msra.mxu1 %vm425_vm8, %v1567_v18 }
  0xf7   : > { %1309 = vmatprep.subr.mxu1 %v1565_v11 }
  0xf8   : > { %1310 = vmatpush3.msk.msra.mxu1 %vm424_vm9, %v1567_v18 }
  0xf9   : > { %1311 = vmatprep.subr.mxu1 %v1565_v11 }
  0xfa   : > { %1312 = vmatpush3.msk.msra.mxu1 %vm423_vm10, %v1567_v18 }
  0xfb   : > { %1313 = vmatprep.subr.mxu1 %v1565_v11 }
  0xfc   : > { %1314 = vmatpush3.msk.msra.mxu1 %vm422_vm11, %v1567_v18 }
  0xfd   : > { %1315 = vmatprep.subr.mxu1 %v1565_v11 }
  0xfe   : > { %1316 = vmatpush3.msk.msra.mxu1 %vm421_vm12, %v1567_v18 }
  0xff   : > { %1317 = vmatprep.subr.mxu1 %v1565_v11 }
 0x100   : > { %1318 = vmatpush3.msk.msra.mxu1 %vm420_vm13, %v1567_v18 }
 0x101   : > { %1319 = vmatprep.subr.mxu1 %v1565_v11 }
 0x102   : > { %1320 = vmatpush3.msk.msra.mxu1 %vm2055_vm14, %v1567_v18  ;;  %vm477_vm14 = vcmp.eq.s32.totalorder %v1715_v19, %v1156_v30 }
 0x103   : > { %1321 = vmatprep.subr.mxu1 %v1565_v11 }
 0x104   : > { %1322 = vmatpush3.msk.msra.mxu1 %vm2052_vm15, %v1567_v18  ;;  %vm480_vm15 = vcmp.eq.s32.totalorder %v1695_v15, %v1156_v30 }
 0x105   : > { %1323 = vmatprep.subr.mxu1 %v1565_v11 }
 0x106   : > { %1324 = vmatpush3.msk.msra.mxu1 %vm2050_vm0, %v1567_v18  ;;  %vm2054_vm0 = vcmp.eq.s32.totalorder %v1682_v12, %v1689_v13 }
 0x107   : > { %1325 = vmatprep.subr.mxu1 %v1565_v11 }
 0x108   : > { %1326 = vmatpush3.msk.msra.mxu1 %vm2051_vm1, %v1567_v18  ;;  %vm481_vm1 = vcmp.eq.s32.totalorder %v1692_v14, %v1156_v30 }
 0x109   : > { %1327 = vmatprep.subr.mxu1 %v1565_v11 }
 0x10a   : > { %1328 = vmatpush3.msk.msra.mxu1 %vm2053_vm2, %v1567_v18  ;;  %vm479_vm2 = vcmp.eq.s32.totalorder %v1698_v16, %v1156_v30 }
 0x10b   : > { %1329 = vmatprep.subr.mxu1 %v1565_v11 }
 0x10c   : > { %1330 = vmatpush3.msk.msra.mxu1 %vm2054_vm0, %v1567_v18  ;;  %vm478_vm0 = vcmp.eq.s32.totalorder %v1705_v17, %v1156_v30  ;;  %v878_v17 = vld [vmem:[#allocation3] sm:$0xff] }
 0x10d   : > { %1332 = vmatmul.mubr.f32.vlgmr.msra.gmra.mxu1 %v389_v31  ;;  %1334 = vmatprep.subr.mxu1 %v1565_v11 }
 0x10e   : > { %1335 = vmatpush3.msk.msra.mxu1 %vm481_vm1, %v1567_v18  ;;  %1366 = vmatprep.mubr.msk.f32.mxu1 %vm1566_vm3, %v1565_v11  ;;  %vm476_vm1 = vcmp.eq.s32.totalorder %v1725_v20, %v1156_v30 }
 0x10f   : > { %1336 = vmatprep.subr.mxu1 %v1565_v11 }
 0x110   : > { %1337 = vmatpush3.msk.msra.mxu1 %vm480_vm15, %v1567_v18  ;;  %vm475_vm15 = vcmp.eq.s32.totalorder %v1735_v21, %v1156_v30 }
 0x111   : > { %1338 = vmatprep.subr.mxu1 %v1565_v11 }
 0x112   : > { %1339 = vmatpush3.msk.msra.mxu1 %vm479_vm2, %v1567_v18  ;;  %vm474_vm2 = vcmp.eq.s32.totalorder %v1745_v22, %v1156_v30 }
 0x113   : > { %1340 = vmatprep.subr.mxu1 %v1565_v11 }
 0x114   : > { %1341 = vmatpush3.msk.msra.mxu1 %vm478_vm0, %v1567_v18  ;;  %vm473_vm0 = vcmp.eq.s32.totalorder %v1755_v23, %v1156_v30 }
 0x115   : > { %1342 = vmatprep.subr.mxu1 %v1565_v11 }
 0x116   : > { %1343 = vmatpush3.msk.msra.mxu1 %vm477_vm14, %v1567_v18  ;;  %vm472_vm14 = vcmp.eq.s32.totalorder %v1765_v24, %v1156_v30 }
 0x117   : > { %1344 = vmatprep.subr.mxu1 %v1565_v11 }
 0x118   : > { %1345 = vmatpush3.msk.msra.mxu1 %vm476_vm1, %v1567_v18  ;;  %vm471_vm1 = vcmp.eq.s32.totalorder %v1775_v25, %v1156_v30 }
 0x119   : > { %1346 = vmatprep.subr.mxu1 %v1565_v11 }
 0x11a   : > { %1347 = vmatpush3.msk.msra.mxu1 %vm475_vm15, %v1567_v18  ;;  %vm470_vm15 = vcmp.eq.s32.totalorder %v1785_v26, %v1156_v30 }
 0x11b   : > { %1348 = vmatprep.subr.mxu1 %v1565_v11 }
 0x11c   : > { %1349 = vmatpush3.msk.msra.mxu1 %vm474_vm2, %v1567_v18  ;;  %vm469_vm2 = vcmp.eq.s32.totalorder %v1795_v27, %v1156_v30 }
 0x11d   : > { %1350 = vmatprep.subr.mxu1 %v1565_v11 }
 0x11e   : > { %1351 = vmatpush3.msk.msra.mxu1 %vm473_vm0, %v1567_v18  ;;  %vm468_vm0 = vcmp.eq.s32.totalorder %v1805_v28, %v1156_v30 }
 0x11f   : > { %1352 = vmatprep.subr.mxu1 %v1565_v11 }
 0x120   : > { %1353 = vmatpush3.msk.msra.mxu1 %vm472_vm14, %v1567_v18  ;;  %vm467_vm14 = vcmp.eq.s32.totalorder %v1815_v29, %v1156_v30 }
 0x121   : > { %1354 = vmatprep.subr.mxu1 %v1565_v11 }
 0x122   : > { %1355 = vmatpush3.msk.msra.mxu1 %vm471_vm1, %v1567_v18  ;;  %vm466_vm1 = vcmp.eq.s32.totalorder %v1682_v12, %v1156_v30 }
 0x123   : > { %1356 = vmatprep.subr.mxu1 %v1565_v11 }
 0x124   : > { %1357 = vmatpush3.msk.msra.mxu1 %vm470_vm15, %v1567_v18  ;;  %vm660_vm15 = vcmask 64512  }
 0x125   : > { %1358 = vmatprep.subr.mxu1 %v1565_v11  ;;  %1371 = vmatprep.mubr.msk.f32.mxu0 %vm660_vm15, %v656_v33 }
 0x126   : > { %1359 = vmatpush3.msk.msra.mxu1 %vm469_vm2, %v1567_v18 }
 0x127   : > { %1360 = vmatprep.subr.mxu1 %v1565_v11 }
 0x128   : > { %1361 = vmatpush3.msk.msra.mxu1 %vm468_vm0, %v1567_v18 }
 0x129   : > { %1362 = vmatprep.subr.mxu1 %v1565_v11 }
 0x12a   : > { %1363 = vmatpush3.msk.msra.mxu1 %vm467_vm14, %v1567_v18 }
 0x12b   : > { %1364 = vmatprep.subr.mxu1 %v1565_v11 }
 0x12c   : > { %1365 = vmatpush3.msk.msra.mxu1 %vm466_vm1, %v1567_v18 }
 0x12d   : > { %1367 = vmatmul.mubr.f32.vlgmr.msra.gmra.mxu1 %v389_v31 }
 0x12e   : > { %1376 = vmatprep.mubr.msk.f32.mxu1 %vm660_vm15, %v654_v32 }
 0x165   : > { %v831_v44 = vpop.permute.xlu0 %830 }
 0x166   : > { %v840_v48 = vmul.f32 %v1209_v45, %v831_v44 }
 0x167   : > { %v826_v47 = vpop.permute.xlu1 %825 }
 0x168   : > { %v839_v51 = vmul.f32 %v1209_v45, %v826_v47 }
 0x16a   : > { %v849_v52 = vpop.permute.xlu0 %848 }
 0x16c   : > { %v845_v57 = vpop.permute.xlu1 %844 }
 0x1cd   : > { %v580_v38 = vpop.f32.mrf.mxu1 }
 0x1ce   : > { %1374 = vmatprep.subr.mxu1 %v580_v38 }
 0x1cf   : > { %v1333_v40 = vpop.f32.mrf.mxu1  ;;  %1375 = vmatpush3.msra.mxu1 %v580_v38 }
 0x1d0   : > { %1377 = vmatmul.mubr.msk.f32.vlgmr.msra.gmra.mxu1 %vm660_vm15, %v655_v39 }
 0x1ed   : > { %v650_v41 = vpop.f32.mrf.mxu1 }
 0x1ee   : > { %1369 = vmatprep.subr.mxu0 %v650_v41 }
 0x1ef   : > { %v1368_v43 = vpop.f32.mrf.mxu1  ;;  %1370 = vmatpush3.msra.mxu0 %v650_v41 }
 0x1f0   : > { %1372 = vmatmul.mubr.msk.f32.vlgmr.msra.gmra.mxu0 %vm660_vm15, %v657_v42  ;;  %1379 = vmatprep.subr.mxu0 %v1565_v11 }
 0x1f1   : > { %1380 = vmatpush3.xpose.msk.msra.mxu0 %vm429_vm4, %v1567_v18  ;;  %1411 = vmatprep.mubr.msk.f32.mxu0 %vm1566_vm3, %v1565_v11  ;;  %vm2056_vm3 = vcmp.eq.s32.totalorder %v1775_v25, %v1689_v13  ;;  %vm2057_vm4 = vcmp.eq.s32.totalorder %v1785_v26, %v1689_v13 }
 0x1f2   : > { %1381 = vmatprep.subr.mxu0 %v1565_v11 }
 0x1f5   : > { %1382 = vmatpush3.xpose.msk.msra.mxu0 %vm428_vm5, %v1567_v18  ;;  %vm2058_vm5 = vcmp.eq.s32.totalorder %v1795_v27, %v1689_v13 }
 0x1f6   : > { %1383 = vmatprep.subr.mxu0 %v1565_v11 }
 0x1f9   : > { %1384 = vmatpush3.xpose.msk.msra.mxu0 %vm427_vm6, %v1567_v18  ;;  %vm2059_vm6 = vcmp.eq.s32.totalorder %v1805_v28, %v1689_v13 }
 0x1fa   : > { %1385 = vmatprep.subr.mxu0 %v1565_v11 }
 0x1fd   : > { %1386 = vmatpush3.xpose.msk.msra.mxu0 %vm426_vm7, %v1567_v18  ;;  %vm2060_vm7 = vcmp.eq.s32.totalorder %v1815_v29, %v1689_v13 }
 0x1fe   : > { %1387 = vmatprep.subr.mxu0 %v1565_v11 }
 0x201   : > { %1388 = vmatpush3.xpose.msk.msra.mxu0 %vm425_vm8, %v1567_v18  ;;  %vm2061_vm8 = vcmp.eq.s32.totalorder %v1682_v12, %v1689_v13 }
 0x202   : > { %1389 = vmatprep.subr.mxu0 %v1565_v11 }
 0x205   : > { %1390 = vmatpush3.xpose.msk.msra.mxu0 %vm424_vm9, %v1567_v18 }
 0x206   : > { %1391 = vmatprep.subr.mxu0 %v1565_v11 }
 0x209   : > { %1392 = vmatpush3.xpose.msk.msra.mxu0 %vm423_vm10, %v1567_v18 }
 0x20a   : > { %1393 = vmatprep.subr.mxu0 %v1565_v11 }
 0x20d   : > { %1394 = vmatpush3.xpose.msk.msra.mxu0 %vm422_vm11, %v1567_v18 }
 0x20e   : > { %1395 = vmatprep.subr.mxu0 %v1565_v11 }
 0x211   : > { %1396 = vmatpush3.xpose.msk.msra.mxu0 %vm421_vm12, %v1567_v18 }
 0x212   : > { %1397 = vmatprep.subr.mxu0 %v1565_v11 }
 0x215   : > { %1398 = vmatpush3.xpose.msk.msra.mxu0 %vm420_vm13, %v1567_v18 }
 0x216   : > { %1399 = vmatprep.subr.mxu0 %v1565_v11 }
 0x219   : > { %1400 = vmatpush3.xpose.msk.msra.mxu0 %vm2056_vm3, %v1567_v18 }
 0x21a   : > { %1401 = vmatprep.subr.mxu0 %v1565_v11 }
 0x21d   : > { %1402 = vmatpush3.xpose.msk.msra.mxu0 %vm2057_vm4, %v1567_v18 }
 0x21e   : > { %1403 = vmatprep.subr.mxu0 %v1565_v11 }
 0x221   : > { %1404 = vmatpush3.xpose.msk.msra.mxu0 %vm2058_vm5, %v1567_v18 }
 0x222   : > { %1405 = vmatprep.subr.mxu0 %v1565_v11 }
 0x225   : > { %1406 = vmatpush3.xpose.msk.msra.mxu0 %vm2059_vm6, %v1567_v18 }
 0x226   : > { %1407 = vmatprep.subr.mxu0 %v1565_v11 }
 0x229   : > { %1408 = vmatpush3.xpose.msk.msra.mxu0 %vm2060_vm7, %v1567_v18 }
 0x22a   : > { %1409 = vmatprep.subr.mxu0 %v1565_v11 }
 0x22d   : > { %1410 = vmatpush3.xpose.msk.msra.mxu0 %vm2061_vm8, %v1567_v18 }
 0x290   : > { %v1378_v46 = vpop.f32.mrf.mxu1 }
 0x292   : > { %v814_v53 = vpop.f32.mrf.mxu1 }
 0x2b0   : > { %v1373_v49 = vpop.f32.mrf.mxu0 }
 0x2b1   : > { %v820_v50 = vadd.f32 %v1378_v46, %v1373_v49 }
 0x2b2   : > { %v733_v54 = vpop.f32.mrf.mxu0 }
 0x2b3   : > { %v815_v55 = vadd.f32 %v814_v53, %v733_v54  ;;  %v842_v56 = vadd.f32 %v840_v48, %v820_v50 }
 0x2b5   : > { %v852_v58 = vadd.f32 %v849_v52, %v842_v56  ;;  %v841_v59 = vadd.f32 %v839_v51, %v815_v55 }
 0x2b7   : > { %v862_v60 = vand.u32 2147483647, %v852_v58  ;;  %v851_v61 = vadd.f32 %v845_v57, %v841_v59  ;;  %v859_v11 = vmax.f32 %v852_v58, 0.0  ;;  %vm860_vm10 = vcmp.ne.f32.partialorder %v852_v58, %v852_v58 }
 0x2b9   : > { %v863_v62 = vsub.f32 0.0, %v862_v60  ;;  %v1210_v0 = vmul.f32 -1.442695, %v851_v61 }
 0x2bb   : > { %v864_v63 = vmul.f32 1.442695, %v863_v62 }
 0x2bd   : > { %1484 = vpow2.f32 %v864_v63 }
 0x2be   : > { %1486 = vpow2.f32 %v1210_v0 }
 0x2ca   : > { %v1485_v1 = vpop.eup %1484 }
 0x2cb   : > { %v866_v2 = vadd.f32 1.0, %v1485_v1  ;;  %v1487_v3 = vpop.eup %1486  ;;  %v869_v5 = vmul.f32 -0.5, %v1485_v1  ;;  %v872_v7 = vand.u32 2147483647, %v1485_v1 }
 0x2cc   : > { %v856_v4 = vadd.f32 1.0, %v1487_v3 }
 0x2cd   : > { %1488 = vlog2.f32 %v866_v2  ;;  %v870_v6 = vadd.f32 1.0, %v869_v5  ;;  %vm873_vm9 = vcmp.lt.f32.partialorder %v872_v7, 0.0004427343 }
 0x2ce   : > { %1490 = vrcp.f32 %v856_v4 }
 0x2cf   : > { %v871_v10 = vmul.f32 %v1485_v1, %v870_v6 }
 0x2da   : > { %v1489_v8 = vpop.eup %1488 }
 0x2db   : > { %v868_v9 = vmul.f32 0.6931472, %v1489_v8  ;;  %v1491_v14 = vpop.eup %1490 }
 0x2dd   : > { %v874_v12 = vsel %vm873_vm9, %v871_v10, %v868_v9 }
 0x2de   : > { %v875_v13 = vadd.f32 %v874_v12, %v859_v11 }
 0x2e0   : > { %v876_v15 = vsel %vm860_vm10, %v852_v58, %v875_v13 }
 0x2e1   : > { %v877_v16 = vmul.f32 %v1491_v14, %v876_v15 }
 0x2e3   : > { %1412 = vmatmul.mubr.f32.vlgmr.msra.gmra.mxu0 %v877_v16 }
 0x3a2   : > { %954 = sbr.rel (%p1227_p12) target bundleno = 945 (0x3b1), region = 56 }
 0x3a3   : > { %v945_v18 = vpop.f32.mrf.mxu0 }
 0x3a4   : > { %v949_v19 = vadd.f32 %v945_v18, %v878_v17 }
 0x3a5   : > { %v1413_v20 = vpop.f32.mrf.mxu0 }
 0x3a6   : > { %950 = vst [vmem:[#allocation3] sm:$0xff] %v949_v19 }
 0x3a7   : > { %v955_v21 = vld [vmem:[#allocation2] sm:$0xff] }
 0x3ad   : > { %v956_v22 = vld [vmem:[#allocation3] sm:$0xff] }
 0x3ae   : > { %v957_v23 = vadd.f32 %v956_v22, %v955_v21 }
 0x3b0   : > { %958 = vst [vmem:[#allocation2] sm:$0xff] %v957_v23 }
 0x3b1 PF: > { %p959_p13 = scmp.eq.s32.totalorder %s1547_s22, 1 }
 0x3b3   : > { %p960_p0 = pnand %p959_p13, %p951_p11 }
 0x3b5   : > { %963 = sbr.rel (%p960_p0) target bundleno = 1153 (0x481), region = 60 }
 0x3ba   : > { %v966_v24 = vld [vmem:[#allocation2] sm:$0xff]  ;;  %v964_v25 = vld [vmem:[%s2047_s4 + $0x10] sm:$0x3]  ;;  %v1570_v26 = vmov 0.0   ;;  %vm1571_vm11 = vmmov 0   ;;  %v1572_v28 = vmov 0  }
 0x3bb   : > { %1414 = vmatprep.subr.mxu0 %v1570_v26  ;;  %1416 = vmatprep.mubr.msk.f32.mxu0 %vm1571_vm11, %v1570_v26  ;;  %v965_v27 = vld [vmem:[%s2047_s4 + $0x18] sm:$0x3] }
 0x3bc   : > { %1415 = vmatpush3.msra.mxu0 %v966_v24  ;;  %1492 = vset.pattern.permute.xlu0 %v1572_v28 }
 0x3bd   : > { %1417 = vmatmul.mubr.msk.f32.vlgmr.msra.gmra.mxu0 %vm660_vm15, %v964_v25  ;;  %969 = vperm.xlu0 %1492, %v965_v27  }
 0x438   : > { %v970_v29 = vpop.permute.xlu0 %969 }
 0x47d   : > { %v1041_v30 = vpop.f32.mrf.mxu0 }
 0x47e   : > { %v1042_v31 = vadd.f32 %v1041_v30, %v970_v29 }
 0x47f   : > { %v1418_v32 = vpop.f32.mrf.mxu0 }
 0x480   : > { %1045 = vst [vmem:[#allocation4] sm:$0x3] %v1042_v31 }
 0x481 PF: > { %s2062_s21 = sadd.s32 4294967295, %s1559_s25   ;;  %s1573_s18 = smov [#allocation4]  }
 0x482   : > { %p2013_p1 = scmp.eq.s32.totalorder %s2062_s21, 3  ;;  %s1053_s19 = sshll.u32 %s1573_s18, 4  ;;  %s1054_s19 = int_to_ptr.vmem [resolvable:$true] %s1053_s19 }
 0x483   : > { %s1493_s20 = scalar_lea.vmem %s1054_s19, 32  ;;  %p1500_p5 = scmp.lt.s32.totalorder %s1054_s19, %s1054_s19 }
 0x484   : > { %p1494_p2 = scmp.ne.s32.totalorder %s1054_s19, %s1493_s20  ;;  %p1501_p6 = scmp.lt.s32.totalorder %s1493_s20, %s1493_s20 }
 0x486   : > { %p1495_p3 = pnand %p1494_p2, %p2013_p1  ;;  %p1502_p7 = por %p1501_p6, %p1500_p5 }
 0x488   : > { %p1496_p4 = pneg %p1495_p3 }
 0x48a   : > { %p1503_p8 = pnand %p1502_p7, %p1496_p4 }
 0x48c   : > { %1506 = shalt.err (!%p1503_p8)
}
 0x48d   : > { %1421 = dma.vmem_to_hbm [thread:$0]  (%p2013_p1), %s1054_s19, 32, %s2049_s6, [#allocation5]  }
 0x48e   : > { %1538 = dma.done.wait (%p2013_p1), [#allocation5], 32  }
 0x48f   : > { %1540 = vsyncadd (%p2013_p1), [#allocation5], 4294967264 }
 0x490 PF: > { %s17_s25 = sadd.s32 1, %s1559_s25   ;;  %s2064_s21 = smov %s1551_s23 }
 0x491   : > { %p14_p9 = scmp.ge.s32.totalorder %s17_s25, 6   ;;  %s2065_s22 = smov %s1555_s24 }
 0x492   : > { %s2066_s23 = smov %s2069_s27  ;;  %s2067_s24 = smov %s2073_s28 }
 0x493   :  { %16 = sbr.rel (!%p14_p9) target bundleno = 3 (0x3), region = 96 }
 0x498   :  { %1066 = vsyncpa [#allocation5], 1 }
 0x499   :  { %1068 = vsyncpa [#allocation5 + $0x1], 1 }

</bundles_post_ra>
